<compile_context>
chip_gen: v6e
topology: v6e:2x2x1
jax: 0.10.0
libtpu: 0.0.40
codegen_flags: <defaults>
</compile_context>

<pallas_src>
import jax
import jax.numpy as jnp
from jax.experimental import pallas as pl
from jax.experimental.pallas import tpu as pltpu

OUT_LANES = 128   # lane-dense padded fc_y output width (true output width is 2)
_TILE_CAP = 4096  # max batch-tile rows (~5 MiB VMEM at cap incl. double buffers)


def _round_up(x, m):
    return ((x + m - 1) // m) * m


def gated_fusion_kernel(ra_ref, rs_ref, rt_ref,
                        wsa_s_ref, wsa_a_ref, bsa_ref,
                        wg_sa_ref, wg_st_ref, wy_ref, by_ref,
                        o_ref):
    # f32 inputs -> bf16 in-vreg (VPU has slack; avoids an XLA cast round trip).
    ra = ra_ref[...].astype(jnp.bfloat16)      # (TILE_N, A)
    rs = rs_ref[...].astype(jnp.bfloat16)      # (TILE_N, S)
    rt = rt_ref[...].astype(jnp.bfloat16)      # (TILE_N, T)

    # Shared term r_s @ Wsa[:S] + b (both branches use fc_sa); f32 accumulation.
    common = (jnp.dot(rs, wsa_s_ref[...], preferred_element_type=jnp.float32)
              + bsa_ref[...])

    # r_sa = fc_sa(cat([r_s, r_a])),  r_st = fc_sa(cat([r_s, r_t]))
    r_sa = common + jnp.dot(ra, wsa_a_ref[...], preferred_element_type=jnp.float32)
    r_st = common + jnp.dot(rt, wsa_a_ref[...], preferred_element_type=jnp.float32)

    # g = sigmoid(fc_g(cat([r_sa, r_st]))) — split-K dots instead of a lane concat.
    g = jax.nn.sigmoid(
        jnp.dot(r_sa.astype(jnp.bfloat16), wg_sa_ref[...],
                preferred_element_type=jnp.float32)
        + jnp.dot(r_st.astype(jnp.bfloat16), wg_st_ref[...],
                  preferred_element_type=jnp.float32))

    # r = g * r_sa + (1 - g) * r_st  ==  r_st + g * (r_sa - r_st)
    r = r_st + g * (r_sa - r_st)

    # y = sigmoid(fc_y(r)) on the zero-padded 128-lane slab (unmasked stores).
    # Padded lanes only compute sigmoid(0)=0.5 — EUP/VPU have slack; sliced off
    # outside the call.
    y = jax.nn.sigmoid(
        jnp.dot(r.astype(jnp.bfloat16), wy_ref[...],
                preferred_element_type=jnp.float32)
        + by_ref[...])
    o_ref[...] = y.astype(o_ref.dtype)         # bf16 writeback (half the bytes)


def prepare_gated_fusion_params(params, acoustic_dim, semantic_dim):
    """One-time weight prep (transpose / split / bf16 cast / zero-pad).

    Hoisted out of the per-call wrapper so it is not re-executed every forward.
    PyTorch weight conventions (out, in):
      fc_sa.weight (E, A+S), fc_sa.bias (E,)
      fc_g.weight  (E, 2E)            (bias=False in the module)
      fc_y.weight  (2, E),  fc_y.bias (2,)
    """
    A, S = acoustic_dim, semantic_dim
    w_sa = params["fc_sa.weight"].T                                # (S+A, E); cat order [r_s, r_a]
    wsa_s = w_sa[:S, :].astype(jnp.bfloat16)                       # (S, E)
    wsa_a = w_sa[S:, :].astype(jnp.bfloat16)                       # (A, E)
    bsa = params["fc_sa.bias"].reshape(1, -1).astype(jnp.float32)  # (1, E)
    E = bsa.shape[1]

    w_g = params["fc_g.weight"].T                                  # (2E, E); cat order [r_sa, r_st]
    wg_sa = w_g[:E, :].astype(jnp.bfloat16)                        # (E, E)
    wg_st = w_g[E:, :].astype(jnp.bfloat16)                        # (E, E)

    # Lane-dense fc_y: zero-pad output width 2 -> 128 so stores are unmasked.
    wy = jnp.zeros((E, OUT_LANES), jnp.bfloat16).at[:, :2].set(
        params["fc_y.weight"].T.astype(jnp.bfloat16))              # (E, 128)
    by = jnp.zeros((1, OUT_LANES), jnp.float32).at[:, :2].set(
        params["fc_y.bias"].reshape(1, -1).astype(jnp.float32))    # (1, 128)

    return dict(wsa_s=wsa_s, wsa_a=wsa_a, bsa=bsa,
                wg_sa=wg_sa, wg_st=wg_st, wy=wy, by=by)


def _choose_tile_n(N):
    if N > _TILE_CAP:
        return _TILE_CAP                       # grid >= 2 steps automatically
    if N >= 64 and N % 16 == 0:
        # >= ~4 steps keeps both v7x TCs busy and prefetch/writeback overlapped;
        # multiple of 16 keeps f32 (8-row) and bf16 (16-row) sublane tiling clean.
        return max(16, _round_up(pl.cdiv(N, 4), 16))
    # Small or non-16-aligned N: one full-array block (block dim == array dim is
    # always legal; avoids ragged bf16 stores for tiny inputs).
    return N


def gated_fusion_block(r_a, r_s, r_t, prepped):
    """Forward pass. `prepped` comes from prepare_gated_fusion_params()."""
    N, A = r_a.shape
    _, S = r_s.shape
    _, T = r_t.shape
    assert T == A, "forward reuses fc_sa for (r_s, r_t); requires timing_dim == acoustic_dim"
    E = prepped["bsa"].shape[1]

    tile_n = _choose_tile_n(N)
    grid = (pl.cdiv(N, tile_n),)   # ragged last block handled by Pallas masking

    row_spec = lambda feat: pl.BlockSpec((tile_n, feat), lambda i: (i, 0))
    const_spec = lambda shape: pl.BlockSpec(shape, lambda i: (0, 0))

    out_padded = pl.pallas_call(
        gated_fusion_kernel,
        out_shape=jax.ShapeDtypeStruct((N, OUT_LANES), jnp.bfloat16),
        grid=grid,
        in_specs=[
            row_spec(A),                    # r_a (f32, cast in-kernel)
            row_spec(S),                    # r_s
            row_spec(T),                    # r_t
            const_spec((S, E)),             # wsa_s (VMEM-resident)
            const_spec((A, E)),             # wsa_a
            const_spec((1, E)),             # bsa
            const_spec((E, E)),             # wg_sa
            const_spec((E, E)),             # wg_st
            const_spec((E, OUT_LANES)),     # wy (zero-padded)
            const_spec((1, OUT_LANES)),     # by (zero-padded)
        ],
        out_specs=pl.BlockSpec((tile_n, OUT_LANES), lambda i: (i, 0)),
        compiler_params=pltpu.CompilerParams(
            dimension_semantics=("parallel",)),
    )(r_a, r_s, r_t,
      prepped["wsa_s"], prepped["wsa_a"], prepped["bsa"],
      prepped["wg_sa"], prepped["wg_st"], prepped["wy"], prepped["by"])

    # Slice the 2 real columns and return f32 (tiny (N, 2) op outside the kernel).
    return out_padded[:, :2].astype(jnp.float32)


def _reference(r_a, r_s, r_t, params):
    """Pure-JAX f32 reference mirroring the PyTorch forward."""
    r_sa = jnp.concatenate([r_s, r_a], -1) @ params["fc_sa.weight"].T + params["fc_sa.bias"]
    r_st = jnp.concatenate([r_s, r_t], -1) @ params["fc_sa.weight"].T + params["fc_sa.bias"]
    g = jax.nn.sigmoid(jnp.concatenate([r_sa, r_st], -1) @ params["fc_g.weight"].T)
    r = g * r_sa + (1 - g) * r_st
    return jax.nn.sigmoid(r @ params["fc_y.weight"].T + params["fc_y.bias"])


if __name__ == "__main__":
    # Small, module-consistent shapes.
    N = 8                 # batch rows
    A = 32                # acoustic_dim
    S = 32                # semantic_dim
    T = 32                # timing_dim (must equal A — forward reuses fc_sa)
    E = 32                # encoding_dim

    key = jax.random.PRNGKey(0)
    k = jax.random.split(key, 8)

    r_a = jax.random.normal(k[0], (N, A), jnp.float32)
    r_s = jax.random.normal(k[1], (N, S), jnp.float32)
    r_t = jax.random.normal(k[2], (N, T), jnp.float32)

    # Deterministic synthetic parameters (PyTorch weight conventions: (out, in)).
    params = {
        "fc_sa.weight": 0.1 * jax.random.normal(k[3], (E, A + S), jnp.float32),
        "fc_sa.bias":   0.1 * jax.random.normal(k[4], (E,), jnp.float32),
        "fc_g.weight":  0.1 * jax.random.normal(k[5], (E, 2 * E), jnp.float32),
        "fc_y.weight":  0.1 * jax.random.normal(k[6], (2, E), jnp.float32),
        "fc_y.bias":    0.1 * jax.random.normal(k[7], (2,), jnp.float32),
    }
    # TODO(synk): fc_st is defined in the PyTorch __init__ but unused in forward
    # (fc_sa is reused for both branches), and get_loss/CrossEntropyLoss is not
    # part of the forward pass — both are intentionally omitted here.

    prepped = prepare_gated_fusion_params(params, A, S)   # one-time weight prep

    y = gated_fusion_block(r_a, r_s, r_t, prepped)
    jax.block_until_ready(y)

    y_ref = _reference(r_a, r_s, r_t, params)
    assert y.shape == (N, 2)
    # bf16 matmul inputs + bf16 writeback vs f32 reference (outputs in [0,1]).
    assert jnp.allclose(y, y_ref, atol=2e-2, rtol=2e-2)

    print("KERNEL_OK")
</pallas_src>

<mosaic_0001>
module attributes {stable_mosaic.version = 11 : i64} {
  func.func @gated_fusion_kernel(%arg0: i32, %arg1: memref<8x32xf32, #tpu.memory_space<vmem>>, %arg2: memref<8x32xf32, #tpu.memory_space<vmem>>, %arg3: memref<8x32xf32, #tpu.memory_space<vmem>>, %arg4: memref<32x32xbf16, #tpu.memory_space<vmem>>, %arg5: memref<32x32xbf16, #tpu.memory_space<vmem>>, %arg6: memref<1x32xf32, #tpu.memory_space<vmem>>, %arg7: memref<32x32xbf16, #tpu.memory_space<vmem>>, %arg8: memref<32x32xbf16, #tpu.memory_space<vmem>>, %arg9: memref<32x128xbf16, #tpu.memory_space<vmem>>, %arg10: memref<1x128xf32, #tpu.memory_space<vmem>>, %arg11: memref<8x128xbf16, #tpu.memory_space<vmem>>) attributes {dimension_semantics = [#tpu.dimension_semantics<parallel>], iteration_bounds = array<i64: 1>, scalar_prefetch = 0 : i64, scratch_operands = 0 : i64, tpu.core_type = #tpu.core_type<tc>, window_params = [{transform_indices = @transform_0, window_bounds = array<i64: 8, 32>}, {transform_indices = @transform_1, window_bounds = array<i64: 8, 32>}, {transform_indices = @transform_2, window_bounds = array<i64: 8, 32>}, {pipeline_mode = #tpu.pipeline_mode<synchronous>, transform_indices = @transform_3, window_bounds = array<i64: 32, 32>}, {pipeline_mode = #tpu.pipeline_mode<synchronous>, transform_indices = @transform_4, window_bounds = array<i64: 32, 32>}, {pipeline_mode = #tpu.pipeline_mode<synchronous>, transform_indices = @transform_5, window_bounds = array<i64: 1, 32>}, {pipeline_mode = #tpu.pipeline_mode<synchronous>, transform_indices = @transform_6, window_bounds = array<i64: 32, 32>}, {pipeline_mode = #tpu.pipeline_mode<synchronous>, transform_indices = @transform_7, window_bounds = array<i64: 32, 32>}, {pipeline_mode = #tpu.pipeline_mode<synchronous>, transform_indices = @transform_8, window_bounds = array<i64: 32, 128>}, {pipeline_mode = #tpu.pipeline_mode<synchronous>, transform_indices = @transform_9, window_bounds = array<i64: 1, 128>}, {transform_indices = @transform_10, window_bounds = array<i64: 8, 128>}]} {
    %c0 = arith.constant 0 : index
    %c0_0 = arith.constant 0 : index
    %0 = vector.load %arg1[%c0, %c0_0] : memref<8x32xf32, #tpu.memory_space<vmem>>, vector<8x32xf32>
    %1 = arith.truncf %0 : vector<8x32xf32> to vector<8x32xbf16>
    %c0_1 = arith.constant 0 : index
    %c0_2 = arith.constant 0 : index
    %2 = vector.load %arg2[%c0_1, %c0_2] : memref<8x32xf32, #tpu.memory_space<vmem>>, vector<8x32xf32>
    %3 = arith.truncf %2 : vector<8x32xf32> to vector<8x32xbf16>
    %c0_3 = arith.constant 0 : index
    %c0_4 = arith.constant 0 : index
    %4 = vector.load %arg3[%c0_3, %c0_4] : memref<8x32xf32, #tpu.memory_space<vmem>>, vector<8x32xf32>
    %5 = arith.truncf %4 : vector<8x32xf32> to vector<8x32xbf16>
    %c0_5 = arith.constant 0 : index
    %c0_6 = arith.constant 0 : index
    %6 = vector.load %arg4[%c0_5, %c0_6] : memref<32x32xbf16, #tpu.memory_space<vmem>>, vector<32x32xbf16>
    %cst = arith.constant dense<0.000000e+00> : vector<8x32xf32>
    %7 = tpu.matmul %3, %6, %cst {dimension_numbers = #tpu.dot_dimension_numbers<[1], [0], [0], [1], [0, 0, 1, 1], [], []>} : vector<8x32xbf16>, vector<32x32xbf16>, vector<8x32xf32> -> vector<8x32xf32>
    %c0_7 = arith.constant 0 : index
    %c0_8 = arith.constant 0 : index
    %8 = vector.load %arg6[%c0_7, %c0_8] : memref<1x32xf32, #tpu.memory_space<vmem>>, vector<1x32xf32>
    %9 = vector.broadcast %8 : vector<1x32xf32> to vector<8x32xf32>
    %10 = arith.addf %7, %9 : vector<8x32xf32>
    %c0_9 = arith.constant 0 : index
    %c0_10 = arith.constant 0 : index
    %11 = vector.load %arg5[%c0_9, %c0_10] : memref<32x32xbf16, #tpu.memory_space<vmem>>, vector<32x32xbf16>
    %cst_11 = arith.constant dense<0.000000e+00> : vector<8x32xf32>
    %12 = tpu.matmul %1, %11, %cst_11 {dimension_numbers = #tpu.dot_dimension_numbers<[1], [0], [0], [1], [0, 0, 1, 1], [], []>} : vector<8x32xbf16>, vector<32x32xbf16>, vector<8x32xf32> -> vector<8x32xf32>
    %13 = arith.addf %10, %12 : vector<8x32xf32>
    %c0_12 = arith.constant 0 : index
    %c0_13 = arith.constant 0 : index
    %14 = vector.load %arg5[%c0_12, %c0_13] : memref<32x32xbf16, #tpu.memory_space<vmem>>, vector<32x32xbf16>
    %cst_14 = arith.constant dense<0.000000e+00> : vector<8x32xf32>
    %15 = tpu.matmul %5, %14, %cst_14 {dimension_numbers = #tpu.dot_dimension_numbers<[1], [0], [0], [1], [0, 0, 1, 1], [], []>} : vector<8x32xbf16>, vector<32x32xbf16>, vector<8x32xf32> -> vector<8x32xf32>
    %16 = arith.addf %10, %15 : vector<8x32xf32>
    %17 = arith.truncf %13 : vector<8x32xf32> to vector<8x32xbf16>
    %c0_15 = arith.constant 0 : index
    %c0_16 = arith.constant 0 : index
    %18 = vector.load %arg7[%c0_15, %c0_16] : memref<32x32xbf16, #tpu.memory_space<vmem>>, vector<32x32xbf16>
    %cst_17 = arith.constant dense<0.000000e+00> : vector<8x32xf32>
    %19 = tpu.matmul %17, %18, %cst_17 {dimension_numbers = #tpu.dot_dimension_numbers<[1], [0], [0], [1], [0, 0, 1, 1], [], []>} : vector<8x32xbf16>, vector<32x32xbf16>, vector<8x32xf32> -> vector<8x32xf32>
    %20 = arith.truncf %16 : vector<8x32xf32> to vector<8x32xbf16>
    %c0_18 = arith.constant 0 : index
    %c0_19 = arith.constant 0 : index
    %21 = vector.load %arg8[%c0_18, %c0_19] : memref<32x32xbf16, #tpu.memory_space<vmem>>, vector<32x32xbf16>
    %cst_20 = arith.constant dense<0.000000e+00> : vector<8x32xf32>
    %22 = tpu.matmul %20, %21, %cst_20 {dimension_numbers = #tpu.dot_dimension_numbers<[1], [0], [0], [1], [0, 0, 1, 1], [], []>} : vector<8x32xbf16>, vector<32x32xbf16>, vector<8x32xf32> -> vector<8x32xf32>
    %23 = arith.addf %19, %22 : vector<8x32xf32>
    %24 = arith.negf %23 : vector<8x32xf32>
    %25 = math.exp %24 : vector<8x32xf32>
    %cst_21 = arith.constant 1.000000e+00 : f32
    %26 = vector.broadcast %cst_21 : f32 to vector<8x32xf32>
    %27 = arith.addf %26, %25 : vector<8x32xf32>
    %28 = arith.divf %26, %27 : vector<8x32xf32>
    %29 = arith.subf %13, %16 : vector<8x32xf32>
    %30 = arith.mulf %28, %29 : vector<8x32xf32>
    %31 = arith.addf %16, %30 : vector<8x32xf32>
    %32 = arith.truncf %31 : vector<8x32xf32> to vector<8x32xbf16>
    %c0_22 = arith.constant 0 : index
    %c0_23 = arith.constant 0 : index
    %33 = vector.load %arg9[%c0_22, %c0_23] : memref<32x128xbf16, #tpu.memory_space<vmem>>, vector<32x128xbf16>
    %cst_24 = arith.constant dense<0.000000e+00> : vector<8x128xf32>
    %34 = tpu.matmul %32, %33, %cst_24 {dimension_numbers = #tpu.dot_dimension_numbers<[1], [0], [0], [1], [0, 0, 1, 1], [], []>} : vector<8x32xbf16>, vector<32x128xbf16>, vector<8x128xf32> -> vector<8x128xf32>
    %c0_25 = arith.constant 0 : index
    %c0_26 = arith.constant 0 : index
    %35 = vector.load %arg10[%c0_25, %c0_26] : memref<1x128xf32, #tpu.memory_space<vmem>>, vector<1x128xf32>
    %36 = vector.broadcast %35 : vector<1x128xf32> to vector<8x128xf32>
    %37 = arith.addf %34, %36 : vector<8x128xf32>
    %38 = arith.negf %37 : vector<8x128xf32>
    %39 = math.exp %38 : vector<8x128xf32>
    %cst_27 = arith.constant 1.000000e+00 : f32
    %40 = vector.broadcast %cst_27 : f32 to vector<8x128xf32>
    %41 = arith.addf %40, %39 : vector<8x128xf32>
    %42 = arith.divf %40, %41 : vector<8x128xf32>
    %43 = arith.truncf %42 : vector<8x128xf32> to vector<8x128xbf16>
    %c0_28 = arith.constant 0 : index
    %c0_29 = arith.constant 0 : index
    %44 = vector.load %arg11[%c0_28, %c0_29] : memref<8x128xbf16, #tpu.memory_space<vmem>>, vector<8x128xbf16>
    tpu.vector_store %arg11[%c0_28, %c0_29], %43 {strides = array<i32>} : memref<8x128xbf16, #tpu.memory_space<vmem>>, vector<8x128xbf16>,
    return
  }
  func.func @transform_0(%arg0: i32) -> (i32, i32) {
    %c0_i32 = arith.constant 0 : i32
    %c0_i32_0 = arith.constant 0 : i32
    return %arg0, %c0_i32 : i32, i32
  }
  func.func @transform_1(%arg0: i32) -> (i32, i32) {
    %c0_i32 = arith.constant 0 : i32
    %c0_i32_0 = arith.constant 0 : i32
    return %arg0, %c0_i32 : i32, i32
  }
  func.func @transform_2(%arg0: i32) -> (i32, i32) {
    %c0_i32 = arith.constant 0 : i32
    %c0_i32_0 = arith.constant 0 : i32
    return %arg0, %c0_i32 : i32, i32
  }
  func.func @transform_3(%arg0: i32) -> (i32, i32) {
    %c0_i32 = arith.constant 0 : i32
    %c0_i32_0 = arith.constant 0 : i32
    %c0_i32_1 = arith.constant 0 : i32
    return %c0_i32, %c0_i32_0 : i32, i32
  }
  func.func @transform_4(%arg0: i32) -> (i32, i32) {
    %c0_i32 = arith.constant 0 : i32
    %c0_i32_0 = arith.constant 0 : i32
    %c0_i32_1 = arith.constant 0 : i32
    return %c0_i32, %c0_i32_0 : i32, i32
  }
  func.func @transform_5(%arg0: i32) -> (i32, i32) {
    %c0_i32 = arith.constant 0 : i32
    %c0_i32_0 = arith.constant 0 : i32
    %c0_i32_1 = arith.constant 0 : i32
    return %c0_i32, %c0_i32_0 : i32, i32
  }
  func.func @transform_6(%arg0: i32) -> (i32, i32) {
    %c0_i32 = arith.constant 0 : i32
    %c0_i32_0 = arith.constant 0 : i32
    %c0_i32_1 = arith.constant 0 : i32
    return %c0_i32, %c0_i32_0 : i32, i32
  }
  func.func @transform_7(%arg0: i32) -> (i32, i32) {
    %c0_i32 = arith.constant 0 : i32
    %c0_i32_0 = arith.constant 0 : i32
    %c0_i32_1 = arith.constant 0 : i32
    return %c0_i32, %c0_i32_0 : i32, i32
  }
  func.func @transform_8(%arg0: i32) -> (i32, i32) {
    %c0_i32 = arith.constant 0 : i32
    %c0_i32_0 = arith.constant 0 : i32
    %c0_i32_1 = arith.constant 0 : i32
    return %c0_i32, %c0_i32_0 : i32, i32
  }
  func.func @transform_9(%arg0: i32) -> (i32, i32) {
    %c0_i32 = arith.constant 0 : i32
    %c0_i32_0 = arith.constant 0 : i32
    %c0_i32_1 = arith.constant 0 : i32
    return %c0_i32, %c0_i32_0 : i32, i32
  }
  func.func @transform_10(%arg0: i32) -> (i32, i32) {
    %c0_i32 = arith.constant 0 : i32
    %c0_i32_0 = arith.constant 0 : i32
    return %arg0, %c0_i32 : i32, i32
  }
}

</mosaic_0001>

<bundles_post_ra>
// kernel: tpu_custom_call.1
= control target key start
LH: loop header
LB: loop body
LE: loop exit
PB: predicated region body
PF: predicated region fallthrough
CT: control target
= control target key end

     0   :  { %15 = vsyncpa [#allocation3], 0  ;;  %s995_s0 = inlined_call_operand.hbm [shape: f32[8,32], index: 0, kind: input, shape index: {}]   ;;  %s996_s1 = inlined_call_operand.hbm [shape: f32[8,32], index: 1, kind: input, shape index: {}]   ;;  %s997_s2 = inlined_call_operand.hbm [shape: f32[8,32], index: 2, kind: input, shape index: {}]   ;;  %s998_s3 = inlined_call_operand.hbm [shape: bf16[32,32], index: 3, kind: input, shape index: {}]   ;;  %s999_s4 = inlined_call_operand.hbm [shape: bf16[32,32], index: 4, kind: input, shape index: {}]   ;;  %s1000_s5 = inlined_call_operand.vmem [shape: f32[1,32], index: 5, kind: input, shape index: {}]   ;;  %s1001_s6 = inlined_call_operand.hbm [shape: bf16[32,32], index: 6, kind: input, shape index: {}]   ;;  %s1002_s7 = inlined_call_operand.hbm [shape: bf16[32,32], index: 7, kind: input, shape index: {}]   ;;  %s1003_s8 = inlined_call_operand.hbm [shape: bf16[32,128], index: 8, kind: input, shape index: {}]   ;;  %s1004_s9 = inlined_call_operand.vmem [shape: f32[1,128], index: 9, kind: input, shape index: {}]   ;;  %s1005_s10 = inlined_call_operand.hbm [shape: bf16[8,128], index: 10, kind: output, shape index: {}]  }
   0x1   :  { %16 = vsyncpa [#allocation6], 0 }
   0x2   :  { %17 = vsyncpa [#allocation9], 0 }
   0x3   :  { %18 = vsyncpa [#allocation12], 0 }
   0x4   :  { %19 = vsyncpa [#allocation15], 0 }
   0x5   :  { %20 = vsyncpa [#allocation4], 0  ;;  %s849_s13 = smov [#allocation5]   ;;  %s850_s15 = smov [#allocation8]  }
   0x6   :  { %s37_s14 = sshll.u32 %s849_s13, 4  ;;  %s56_s16 = sshll.u32 %s850_s15, 4  ;;  %s38_s14 = int_to_ptr.vmem [resolvable:$true] %s37_s14  ;;  %s57_s16 = int_to_ptr.vmem [resolvable:$true] %s56_s16 }
   0x7   :  { %s665_s17 = scalar_lea.vmem %s38_s14, 128  ;;  %p670_p1 = scmp.lt.s32.totalorder %s38_s14, %s38_s14 }
   0x8   :  { %p666_p0 = scmp.ne.s32.totalorder %s38_s14, %s665_s17  ;;  %p671_p2 = scmp.lt.s32.totalorder %s665_s17, %s665_s17 }
   0xa   :  { %p672_p3 = por %p671_p2, %p670_p1 }
   0xc   :  { %p673_p4 = pnand %p672_p3, %p666_p0 }
   0xe   :  { %676 = shalt.err (!%p673_p4)
}
   0xf   :  { %40 = dma.hbm_to_vmem [thread:$0]  %s996_s1, 128, %s38_s14, [#allocation6]  }
  0x10   :  { %s685_s20 = scalar_lea.vmem %s57_s16, 256  ;;  %p690_p6 = scmp.lt.s32.totalorder %s57_s16, %s57_s16 }
  0x11   :  { %p686_p5 = scmp.ne.s32.totalorder %s57_s16, %s685_s20  ;;  %p691_p7 = scmp.lt.s32.totalorder %s685_s20, %s685_s20 }
  0x13   :  { %p692_p8 = por %p691_p7, %p690_p6 }
  0x15   :  { %p693_p9 = pnand %p692_p8, %p686_p5 }
  0x17   :  { %696 = shalt.err (!%p693_p9)
}
  0x18   :  { %s851_s21 = smov 64   ;;  %s852_s22 = smov 4  }
  0x19   :  { %62 = dma.hbm_to_vmem [thread:$0]  %s998_s3, 256, %s57_s16, [#allocation9], %s851_s21, %s851_s21, %s852_s22  }
  0x1a   :  { %s853_s25 = smov [#allocation11]   ;;  %s854_s27 = smov [#allocation2]  }
  0x1b   :  { %s82_s26 = sshll.u32 %s853_s25, 4  ;;  %s27_s1 = sshll.u32 %s854_s27, 4  ;;  %s83_s26 = int_to_ptr.vmem [resolvable:$true] %s82_s26  ;;  %s28_s1 = int_to_ptr.vmem [resolvable:$true] %s27_s1 }
  0x1c   :  { %s705_s28 = scalar_lea.vmem %s83_s26, 256  ;;  %p710_p11 = scmp.lt.s32.totalorder %s83_s26, %s83_s26 }
  0x1d   :  { %p706_p10 = scmp.ne.s32.totalorder %s83_s26, %s705_s28  ;;  %p711_p12 = scmp.lt.s32.totalorder %s705_s28, %s705_s28 }
  0x1f   :  { %p712_p13 = por %p711_p12, %p710_p11 }
  0x21   :  { %p713_p0 = pnand %p712_p13, %p706_p10 }
  0x23   :  { %716 = shalt.err (!%p713_p0)
}
  0x24   :  { %88 = dma.hbm_to_vmem [thread:$0]  %s1001_s6, 256, %s83_s26, [#allocation12], %s851_s21, %s851_s21, %s852_s22  }
  0x25   :  { %s725_s3 = scalar_lea.vmem %s28_s1, 128  ;;  %p730_p2 = scmp.lt.s32.totalorder %s28_s1, %s28_s1 }
  0x26   :  { %p726_p1 = scmp.ne.s32.totalorder %s28_s1, %s725_s3  ;;  %p731_p3 = scmp.lt.s32.totalorder %s725_s3, %s725_s3 }
  0x28   :  { %p732_p4 = por %p731_p3, %p730_p2 }
  0x2a   :  { %p733_p5 = pnand %p732_p4, %p726_p1 }
  0x2c   :  { %736 = shalt.err (!%p733_p5)
}
  0x2d   :  { %30 = dma.hbm_to_vmem [thread:$0]  %s995_s0, 128, %s28_s1, [#allocation3]  }
  0x2e   :  { %s855_s13 = smov [#allocation7]   ;;  %s856_s15 = smov [#allocation10]  }
  0x2f   :  { %s47_s14 = sshll.u32 %s855_s13, 4  ;;  %s68_s16 = sshll.u32 %s856_s15, 4  ;;  %s48_s14 = int_to_ptr.vmem [resolvable:$true] %s47_s14  ;;  %s69_s16 = int_to_ptr.vmem [resolvable:$true] %s68_s16 }
  0x30   :  { %s745_s17 = scalar_lea.vmem %s48_s14, 128  ;;  %p750_p7 = scmp.lt.s32.totalorder %s48_s14, %s48_s14 }
  0x31   :  { %p746_p6 = scmp.ne.s32.totalorder %s48_s14, %s745_s17  ;;  %p751_p8 = scmp.lt.s32.totalorder %s745_s17, %s745_s17 }
  0x33   :  { %p752_p9 = por %p751_p8, %p750_p7 }
  0x35   :  { %p753_p10 = pnand %p752_p9, %p746_p6 }
  0x37   :  { %756 = shalt.err (!%p753_p10)
}
  0x38   :  { %50 = dma.hbm_to_vmem [thread:$0]  %s997_s2, 128, %s48_s14, [#allocation6]  }
  0x39   :  { %s765_s19 = scalar_lea.vmem %s69_s16, 256  ;;  %p770_p12 = scmp.lt.s32.totalorder %s69_s16, %s69_s16 }
  0x3a   :  { %p766_p11 = scmp.ne.s32.totalorder %s69_s16, %s765_s19  ;;  %p771_p13 = scmp.lt.s32.totalorder %s765_s19, %s765_s19 }
  0x3c   :  { %p772_p0 = por %p771_p13, %p770_p12 }
  0x3e   :  { %p773_p1 = pnand %p772_p0, %p766_p11 }
  0x40   :  { %776 = shalt.err (!%p773_p1)
}
  0x41   :  { %74 = dma.hbm_to_vmem [thread:$0]  %s999_s4, 256, %s69_s16, [#allocation9], %s851_s21, %s851_s21, %s852_s22  }
  0x42   :  { %s857_s23 = smov [#allocation13]   ;;  %s858_s25 = smov [#allocation14]  }
  0x43   :  { %s94_s24 = sshll.u32 %s857_s23, 4  ;;  %s106_s26 = sshll.u32 %s858_s25, 4  ;;  %s95_s24 = int_to_ptr.vmem [resolvable:$true] %s94_s24  ;;  %s107_s26 = int_to_ptr.vmem [resolvable:$true] %s106_s26 }
  0x44   :  { %s785_s2 = scalar_lea.vmem %s95_s24, 256  ;;  %p790_p3 = scmp.lt.s32.totalorder %s95_s24, %s95_s24 }
  0x45   :  { %p786_p2 = scmp.ne.s32.totalorder %s95_s24, %s785_s2  ;;  %p791_p4 = scmp.lt.s32.totalorder %s785_s2, %s785_s2 }
  0x47   :  { %p792_p5 = por %p791_p4, %p790_p3 }
  0x49   :  { %p793_p6 = pnand %p792_p5, %p786_p2 }
  0x4b   :  { %796 = shalt.err (!%p793_p6)
}
  0x4c   :  { %100 = dma.hbm_to_vmem [thread:$0]  %s1002_s7, 256, %s95_s24, [#allocation12], %s851_s21, %s851_s21, %s852_s22  }
  0x4d   :  { %s805_s4 = scalar_lea.vmem %s107_s26, 256  ;;  %p810_p8 = scmp.lt.s32.totalorder %s107_s26, %s107_s26 }
  0x4e   :  { %p806_p7 = scmp.ne.s32.totalorder %s107_s26, %s805_s4  ;;  %p811_p9 = scmp.lt.s32.totalorder %s805_s4, %s805_s4 }
  0x50   :  { %p812_p10 = por %p811_p9, %p810_p8 }
  0x52   :  { %p813_p11 = pnand %p812_p10, %p806_p7 }
  0x54   :  { %816 = shalt.err (!%p813_p11)
}
  0x55   :  { %112 = dma.hbm_to_vmem [thread:$0]  %s1003_s8, 256, %s107_s26, [#allocation15], %s851_s21, %s851_s21, %s852_s22  }
  0x56   :  { %837 = dma.done.wait [#allocation3], 128  }
  0x57   :  { %838 = vsyncadd [#allocation3], 4294967168 }
  0x58   :  { %839 = dma.done.wait [#allocation6], 256  }
  0x59   :  { %840 = vsyncadd [#allocation6], 4294967040 }
  0x5a   :  { %841 = dma.done.wait [#allocation9], 512  }
  0x5b   :  { %842 = vsyncadd [#allocation9], 4294966784 }
  0x5c   :  { %843 = dma.done.wait [#allocation12], 512  }
  0x5d   :  { %844 = vsyncadd [#allocation12], 4294966784 }
  0x5e   :  { %845 = dma.done.wait [#allocation15], 256  }
  0x5f   :  { %846 = vsyncadd [#allocation15], 4294967040  ;;  %v859_v0 = vmov 0.0   ;;  %vm860_vm0 = vmmov 0   ;;  %v639_v1 = vld [vmem:[#allocation8 + $0x8] sm:$0xff]   ;;  %v640_v2 = vld [vmem:[#allocation10 + $0x8] sm:$0xff]  }
  0x60   :  { %578 = vmatprep.subr.bf16.mxu0 %v859_v0  ;;  %586 = vmatprep.subr.bf16.mxu1 %v859_v0  ;;  %v641_v3 = vld [vmem:[#allocation8] sm:$0xff]   ;;  %v642_v4 = vld [vmem:[#allocation10] sm:$0xff]   ;;  %v140_v6 = vld [vmem:[#allocation2] sm:$0xff]  ;;  %vm169_vm1 = vcmask 261120   ;;  %s861_s22 = smov [#allocation16]  }
  0x61   :  { %582 = vmatprep.mubr.msk.bf16.mxu0 %vm860_vm0, %v859_v0  ;;  %590 = vmatprep.mubr.msk.bf16.mxu1 %vm860_vm0, %v859_v0  ;;  %v142_v5 = vld [vmem:[#allocation5] sm:$0xff]  ;;  %v141_v8 = vpack.c.bf16 %v140_v6, %v140_v6  ;;  %v144_v9 = vld [vmem:[#allocation7] sm:$0xff]  ;;  %v643_v11 = vld [vmem:[#allocation11 + $0x8] sm:$0xff]   ;;  %s527_s30 = sshll.u32 %s861_s22, 4  ;;  %s528_s30 = int_to_ptr.vmem [resolvable:$true] %s527_s30 }
  0x62   :  { %579 = vmatpush3.bf16.msra.mxu0 %v639_v1  ;;  %587 = vmatpush3.bf16.msra.mxu1 %v640_v2  ;;  %v143_v7 = vpack.c.bf16 %v142_v5, %v142_v5  ;;  %v145_v10 = vpack.c.bf16 %v144_v9, %v144_v9  ;;  %v644_v12 = vld [vmem:[#allocation11] sm:$0xff]   ;;  %v645_v13 = vld [vmem:[#allocation13 + $0x8] sm:$0xff]   ;;  %v646_v14 = vld [vmem:[#allocation13] sm:$0xff]   ;;  %s817_s3 = scalar_lea.vmem %s528_s30, 64  ;;  %p822_p13 = scmp.lt.s32.totalorder %s528_s30, %s528_s30 }
  0x63   :  { %580 = vmatprep.subr.bf16.mxu0 %v859_v0  ;;  %588 = vmatprep.subr.bf16.mxu1 %v859_v0  ;;  %v540_v15 = vld [vmem:[%s1000_s5] ss:$0 sm:$0xff]  ;;  %v648_v34 = vld [vmem:[#allocation14] sm:$0xff]   ;;  %p818_p12 = scmp.ne.s32.totalorder %s528_s30, %s817_s3  ;;  %p823_p0 = scmp.lt.s32.totalorder %s817_s3, %s817_s3 }
  0x64   :  { %v647_v33 = vld [vmem:[#allocation14 + $0x8] sm:$0xff]  }
  0x65   :  { %v555_v52 = vld [vmem:[%s1004_s9] ss:$0 sm:$0xff]  ;;  %p824_p1 = por %p823_p0, %p822_p13 }
  0x66   :  { %581 = vmatpush3.bf16.msra.mxu0 %v641_v3  ;;  %589 = vmatpush3.bf16.msra.mxu1 %v642_v4 }
  0x67   :  { %594 = vmatprep.subr.bf16.mxu0 %v859_v0  ;;  %602 = vmatprep.subr.bf16.mxu1 %v859_v0  ;;  %p825_p2 = pnand %p824_p1, %p818_p12 }
  0x69   :  { %583 = vmatmul.mubr.msk.bf16.vlgmr.msra.gmra.mxu0 %vm169_vm1, %v143_v7  ;;  %591 = vmatmul.mubr.msk.bf16.vlgmr.msra.gmra.mxu1 %vm169_vm1, %v141_v8 }
  0x6a   :  { %595 = vmatpush3.bf16.msra.mxu0 %v640_v2  ;;  %598 = vmatprep.mubr.msk.bf16.mxu0 %vm860_vm0, %v859_v0 }
  0x6b   :  { %596 = vmatprep.subr.bf16.mxu0 %v859_v0  ;;  %606 = vmatprep.mubr.msk.bf16.mxu1 %vm860_vm0, %v859_v0 }
  0x6c   :  { %603 = vmatpush3.bf16.msra.mxu1 %v645_v13 }
  0x6d   :  { %604 = vmatprep.subr.bf16.mxu1 %v859_v0 }
  0x6e   :  { %597 = vmatpush3.bf16.msra.mxu0 %v642_v4 }
  0x6f   :  { %610 = vmatprep.subr.bf16.mxu0 %v859_v0 }
  0x70   :  { %605 = vmatpush3.bf16.msra.mxu1 %v646_v14 }
  0x71   :  { %599 = vmatmul.mubr.msk.bf16.vlgmr.msra.gmra.mxu0 %vm169_vm1, %v145_v10  ;;  %618 = vmatprep.subr.bf16.mxu1 %v859_v0 }
  0x72   :  { %614 = vmatprep.mubr.msk.bf16.mxu0 %vm860_vm0, %v859_v0  ;;  %611 = vmatpush3.bf16.msra.mxu0 %v643_v11 }
  0x73   :  { %612 = vmatprep.subr.bf16.mxu0 %v859_v0 }
  0x76   :  { %613 = vmatpush3.bf16.msra.mxu0 %v644_v12 }
 0x129   :  { %v207_v16 = vpop.f32.mrf.mxu0  ;;  %v266_v18 = vpop.f32.mrf.mxu1 }
 0x12a   :  { %v208_v17 = vadd.f32 %v540_v15, %v207_v16 }
 0x12b   :  { %v584_v19 = vpop.f32.mrf.mxu0  ;;  %v592_v21 = vpop.f32.mrf.mxu1 }
 0x12c   :  { %v272_v20 = vadd.f32 %v266_v18, %v208_v17 }
 0x12d   :  { %v210_v22 = vpop.f32.mrf.mxu0  ;;  %v269_v24 = vpop.f32.mrf.mxu1 }
 0x12e   :  { %v317_v23 = vpack.c.bf16 %v272_v20, %v272_v20 }
 0x12f   :  { %v585_v25 = vpop.f32.mrf.mxu0  ;;  %v593_v26 = vpop.f32.mrf.mxu1 }
 0x130   :  { %615 = vmatmul.mubr.msk.bf16.vlgmr.msra.gmra.mxu0 %vm169_vm1, %v317_v23 }
 0x131   :  { %v310_v27 = vpop.f32.mrf.mxu0 }
 0x132   :  { %v316_v28 = vadd.f32 %v310_v27, %v208_v17 }
 0x133   :  { %v600_v29 = vpop.f32.mrf.mxu0 }
 0x134   :  { %v322_v30 = vpack.c.bf16 %v316_v28, %v316_v28  ;;  %v443_v47 = vsub.f32 %v272_v20, %v316_v28 }
 0x135   :  { %v313_v31 = vpop.f32.mrf.mxu0 }
 0x136   :  { %607 = vmatmul.mubr.msk.bf16.vlgmr.msra.gmra.mxu1 %vm169_vm1, %v322_v30 }
 0x137   :  { %v601_v32 = vpop.f32.mrf.mxu0  ;;  %622 = vmatprep.mubr.msk.bf16.mxu1 %vm860_vm0, %v859_v0  ;;  %619 = vmatpush3.bf16.msra.mxu1 %v647_v33 }
 0x138   :  { %620 = vmatprep.subr.bf16.mxu1 %v859_v0 }
 0x13b   :  { %621 = vmatpush3.bf16.msra.mxu1 %v648_v34 }
 0x1f0   :  { %v431_v35 = vpop.f32.mrf.mxu0 }
 0x1f2   :  { %v616_v36 = vpop.f32.mrf.mxu0 }
 0x1f4   :  { %v434_v37 = vpop.f32.mrf.mxu0 }
 0x1f6   :  { %v376_v38 = vpop.f32.mrf.mxu1  ;;  %v617_v39 = vpop.f32.mrf.mxu0 }
 0x1f7   :  { %v432_v40 = vadd.f32 %v431_v35, %v376_v38 }
 0x1f8   :  { %v608_v41 = vpop.f32.mrf.mxu1 }
 0x1f9   :  { %v554_v42 = vmul.f32 -1.442695, %v432_v40 }
 0x1fa   :  { %v379_v43 = vpop.f32.mrf.mxu1 }
 0x1fb   :  { %649 = vpow2.f32 %v554_v42 }
 0x1fc   :  { %v609_v44 = vpop.f32.mrf.mxu1 }
 0x208   :  { %v650_v45 = vpop.eup %649 }
 0x209   :  { %v440_v46 = vadd.f32 1.0, %v650_v45 }
 0x20b   :  { %651 = vrcp.f32 %v440_v46 }
 0x218   :  { %v652_v48 = vpop.eup %651 }
 0x219   :  { %v444_v49 = vmul.f32 %v652_v48, %v443_v47 }
 0x21b   :  { %v445_v50 = vadd.f32 %v444_v49, %v316_v28 }
 0x21d   :  { %v446_v51 = vpack.c.bf16 %v445_v50, %v445_v50 }
 0x21f   :  { %623 = vmatmul.mubr.msk.bf16.vlgmr.msra.gmra.mxu1 %vm169_vm1, %v446_v51 }
 0x2df   :  { %v507_v53 = vpop.f32.mrf.mxu1 }
 0x2e0   :  { %v508_v54 = vadd.f32 %v555_v52, %v507_v53 }
 0x2e1   :  { %v624_v55 = vpop.f32.mrf.mxu1 }
 0x2e2   :  { %v559_v56 = vmul.f32 -1.442695, %v508_v54 }
 0x2e3   :  { %v510_v57 = vpop.f32.mrf.mxu1 }
 0x2e4   :  { %653 = vpow2.f32 %v559_v56 }
 0x2e5   :  { %v625_v58 = vpop.f32.mrf.mxu1 }
 0x2f1   :  { %v654_v59 = vpop.eup %653 }
 0x2f2   :  { %v516_v60 = vadd.f32 1.0, %v654_v59 }
 0x2f4   :  { %655 = vrcp.f32 %v516_v60 }
 0x301   :  { %v656_v61 = vpop.eup %655 }
 0x302   :  { %v519_v62 = vpack.c.bf16 %v656_v61, %v656_v61 }
 0x304   :  { %520 = vst [vmem:[#allocation16] sm:$0xf] %v519_v62 }
 0x305   :  { %828 = shalt.err (!%p825_p2)
}
 0x306   :  { %530 = dma.vmem_to_hbm [thread:$0]  %s528_s30, 64, %s1005_s10, [#allocation4]  }
 0x307   :  { %847 = dma.done.wait [#allocation4], 64  }
 0x308   :  { %848 = vsyncadd [#allocation4], 4294967232 }
 0x309   :  { %534 = vsyncpa [#allocation3], 1 }
 0x30a   :  { %535 = vsyncpa [#allocation6], 1 }
 0x30b   :  { %536 = vsyncpa [#allocation9], 1 }
 0x30c   :  { %537 = vsyncpa [#allocation12], 1 }
 0x30d   :  { %538 = vsyncpa [#allocation15], 1 }
 0x30e   :  { %539 = vsyncpa [#allocation4], 1 }

</bundles_post_ra>
